<compile_context>
chip_gen: v6e
topology: v6e:2x2x1
jax: 0.10.0
libtpu: 0.0.40
codegen_flags: <defaults>
</compile_context>

<pallas_src>
import jax
import jax.numpy as jnp
from jax.experimental import pallas as pl
from jax.experimental.pallas import tpu as pltpu

NEG_SLOPE = 0.01  # F.leaky_relu default
BN_EPS = 1e-5     # nn.BatchNorm2d default


def _leaky_relu(v):
    return jnp.where(v > 0, v, NEG_SLOPE * v)


def _make_kernel(H, W, C, K, pad):
    WC = W * C
    pc = pad * C

    def kernel(x_ref, w1_ref, w2_ref, s1_ref, s2_ref, out_ref):
        # x_ref  : (1, H, W*C)            packed NHWC activations (one image)
        # w*_ref : (K, (W+2p)*C, W*C)     banded conv weights (BN scale folded)
        # s*_ref : (1, W*C)               packed shift = tile(bias*scale + shift)
        # out_ref: (1, H, W*C)
        x = x_ref[0].astype(jnp.float32)                     # lane-dense load
        xa = _leaky_relu(x)

        def pad_packed(a):
            # zero halo: W-pad is pad*C zero lanes, H-pad is `pad` zero rows.
            zc = jnp.zeros((H, pc), jnp.float32)
            a = jnp.concatenate([zc, a, zc], axis=1)         # (H, (W+2p)*C)
            zr = jnp.zeros((pad, a.shape[1]), jnp.float32)
            return jnp.concatenate([zr, a, zr], axis=0)      # (H+2p, (W+2p)*C)

        def conv(a_padded, w_ref, s_ref):
            # TODO(synk): cast to bf16 for the MXU on v6e/v7x at production
            # channel counts; kept fp32 here for tight tolerance at toy size.
            acc = jnp.zeros((H, WC), jnp.float32)
            for kh in range(K):                              # static unroll
                acc += jnp.dot(a_padded[kh:kh + H, :], w_ref[kh],
                               preferred_element_type=jnp.float32)
            return acc + s_ref[...]

        h1 = _leaky_relu(conv(pad_packed(xa), w1_ref, s1_ref))   # conv1+BN1+lrelu
        y = conv(pad_packed(h1), w2_ref, s2_ref)                 # conv2+BN2
        out_ref[0] = (y + x).astype(out_ref.dtype)               # residual, lane-dense

    return kernel


def _band_weights(w_hwio, W, pad):
    """(KH, KW, Cin, Cout) conv weights -> (KH, (W+2p)*Cin, W*Cout) band matrices."""
    KH, KW, Cin, Cout = w_hwio.shape
    Wp = W + 2 * pad
    bands = []
    for kh in range(KH):
        b = jnp.zeros((Wp * Cin, W * Cout), w_hwio.dtype)
        for kw in range(KW):
            # (Cin, Cout) tap placed at padded input position wo+kw, output wo.
            b = b + jnp.kron(jnp.eye(Wp, W, k=-kw, dtype=w_hwio.dtype),
                             w_hwio[kh, kw])
        bands.append(b)
    return jnp.stack(bands)


def resnet_block(x_nchw, p, *, kernel=3):
    """x_nchw: (N, C, H, W) float32 (PyTorch layout). Returns NCHW."""
    N, C, H, W = x_nchw.shape
    pad = kernel // 2
    WC = W * C
    WpC = (W + 2 * pad) * C

    # NCHW -> lane-packed (N, H, W*C).  (Kept here only to match the PyTorch
    # NCHW test interface; inside a larger model keep activations packed.)
    x = jnp.transpose(x_nchw, (0, 2, 3, 1)).reshape(N, H, WC)

    # Fold BatchNorm (inference) into conv weights / shifts.
    s1 = p["gamma1"] / jnp.sqrt(p["var1"] + BN_EPS)
    s2 = p["gamma2"] / jnp.sqrt(p["var2"] + BN_EPS)
    w1 = jnp.transpose(p["w1"], (2, 3, 1, 0)) * s1      # OIHW -> HWIO, scale cout
    w2 = jnp.transpose(p["w2"], (2, 3, 1, 0)) * s2
    shift1 = (p["b1"] - p["mean1"]) * s1 + p["beta1"]   # (C,)
    shift2 = (p["b2"] - p["mean2"]) * s2 + p["beta2"]

    bigw1 = _band_weights(w1, W, pad)                   # (K, WpC, WC)
    bigw2 = _band_weights(w2, W, pad)
    s1p = jnp.tile(shift1, W).reshape(1, WC)            # packed per-lane shift
    s2p = jnp.tile(shift2, W).reshape(1, WC)

    out_packed = pl.pallas_call(
        _make_kernel(H, W, C, kernel, pad),
        out_shape=jax.ShapeDtypeStruct((N, H, WC), x.dtype),
        grid=(N,),
        in_specs=[
            pl.BlockSpec((1, H, WC), lambda i: (i, 0, 0)),
            pl.BlockSpec((kernel, WpC, WC), lambda i: (0, 0, 0)),
            pl.BlockSpec((kernel, WpC, WC), lambda i: (0, 0, 0)),
            pl.BlockSpec((1, WC), lambda i: (0, 0)),
            pl.BlockSpec((1, WC), lambda i: (0, 0)),
        ],
        out_specs=pl.BlockSpec((1, H, WC), lambda i: (i, 0, 0)),
        compiler_params=pltpu.CompilerParams(dimension_semantics=("parallel",)),
    )(x, bigw1, bigw2, s1p, s2p)

    return jnp.transpose(out_packed.reshape(N, H, W, C), (0, 3, 1, 2))


def reference(x, p, *, kernel=3):
    """Pure-JAX reference of the PyTorch forward (eval mode), NCHW."""
    pad = kernel // 2

    def conv(h, w, b):
        return jax.lax.conv_general_dilated(
            h, w, window_strides=(1, 1), padding=((pad, pad), (pad, pad)),
            dimension_numbers=("NCHW", "OIHW", "NCHW")) + b[None, :, None, None]

    def bn(h, gamma, beta, mean, var):
        s = gamma / jnp.sqrt(var + BN_EPS)
        return h * s[None, :, None, None] + (beta - mean * s)[None, :, None, None]

    h = _leaky_relu(x)
    h = conv(h, p["w1"], p["b1"])
    h = bn(h, p["gamma1"], p["beta1"], p["mean1"], p["var1"])
    h = _leaky_relu(h)
    h = conv(h, p["w2"], p["b2"])
    h = bn(h, p["gamma2"], p["beta2"], p["mean2"], p["var2"])
    return h + x


if __name__ == "__main__":
    # ResNetBlock(in_channels=8, out_channels=8, kernel=3, stride=1, dropout=0.1)
    N, C, H, W, K = 2, 8, 16, 16, 3   # W*C = 128 -> exactly lane-dense

    key = jax.random.PRNGKey(0)
    keys = jax.random.split(key, 9)

    x = jax.random.normal(keys[0], (N, C, H, W), jnp.float32)

    params = {
        "w1": jax.random.normal(keys[1], (C, C, K, K), jnp.float32) * 0.1,
        "b1": jax.random.normal(keys[2], (C,), jnp.float32) * 0.1,
        "w2": jax.random.normal(keys[3], (C, C, K, K), jnp.float32) * 0.1,
        "b2": jax.random.normal(keys[4], (C,), jnp.float32) * 0.1,
        # BatchNorm parameters / running statistics (deterministic, non-trivial)
        "gamma1": 1.0 + 0.1 * jax.random.normal(keys[5], (C,), jnp.float32),
        "beta1": 0.1 * jax.random.normal(keys[6], (C,), jnp.float32),
        "mean1": 0.05 * jnp.arange(C, dtype=jnp.float32),
        "var1": 1.0 + 0.02 * jnp.arange(C, dtype=jnp.float32),
        "gamma2": 1.0 + 0.1 * jax.random.normal(keys[7], (C,), jnp.float32),
        "beta2": 0.1 * jax.random.normal(keys[8], (C,), jnp.float32),
        "mean2": -0.03 * jnp.arange(C, dtype=jnp.float32),
        "var2": 1.0 + 0.03 * jnp.arange(C, dtype=jnp.float32),
    }

    out = resnet_block(x, params, kernel=K)
    out = jax.block_until_ready(out)

    ref = jax.block_until_ready(reference(x, params, kernel=K))
    assert out.shape == (N, C, H, W)
    assert jnp.allclose(out, ref, atol=2e-3, rtol=2e-3), "mismatch vs pure-JAX reference"

    print("KERNEL_OK")
</pallas_src>

<mosaic_0001>
module attributes {stable_mosaic.version = 11 : i64} {
  func.func @kernel(%arg0: i32, %arg1: memref<1x16x128xf32, #tpu.memory_space<vmem>>, %arg2: memref<3x144x128xf32, #tpu.memory_space<vmem>>, %arg3: memref<3x144x128xf32, #tpu.memory_space<vmem>>, %arg4: memref<1x128xf32, #tpu.memory_space<vmem>>, %arg5: memref<1x128xf32, #tpu.memory_space<vmem>>, %arg6: memref<1x16x128xf32, #tpu.memory_space<vmem>>) attributes {dimension_semantics = [#tpu.dimension_semantics<parallel>], iteration_bounds = array<i64: 2>, scalar_prefetch = 0 : i64, scratch_operands = 0 : i64, tpu.core_type = #tpu.core_type<tc>, window_params = [{transform_indices = @transform_0, window_bounds = array<i64: 1, 16, 128>}, {pipeline_mode = #tpu.pipeline_mode<synchronous>, transform_indices = @transform_1, window_bounds = array<i64: 3, 144, 128>}, {pipeline_mode = #tpu.pipeline_mode<synchronous>, transform_indices = @transform_2, window_bounds = array<i64: 3, 144, 128>}, {pipeline_mode = #tpu.pipeline_mode<synchronous>, transform_indices = @transform_3, window_bounds = array<i64: 1, 128>}, {pipeline_mode = #tpu.pipeline_mode<synchronous>, transform_indices = @transform_4, window_bounds = array<i64: 1, 128>}, {transform_indices = @transform_5, window_bounds = array<i64: 1, 16, 128>}]} {
    %c0 = arith.constant 0 : index
    %c0_0 = arith.constant 0 : index
    %c0_1 = arith.constant 0 : index
    %0 = vector.load %arg1[%c0, %c0_0, %c0_1] : memref<1x16x128xf32, #tpu.memory_space<vmem>>, vector<1x16x128xf32>
    %1 = vector.shape_cast %0 : vector<1x16x128xf32> to vector<16x128xf32>
    %cst = arith.constant 0.000000e+00 : f32
    %2 = vector.broadcast %cst : f32 to vector<16x128xf32>
    %3 = arith.cmpf ogt, %1, %2 : vector<16x128xf32>
    %cst_2 = arith.constant 0.00999999977 : f32
    %4 = vector.broadcast %cst_2 : f32 to vector<16x128xf32>
    %5 = arith.mulf %4, %1 : vector<16x128xf32>
    %6 = arith.select %3, %1, %5 : vector<16x128xi1>, vector<16x128xf32>
    %cst_3 = arith.constant 0.000000e+00 : f32
    %7 = vector.broadcast %cst_3 : f32 to vector<16x8xf32>
    %8 = tpu.concatenate %7, %6, %7 in 1 : vector<16x8xf32>, vector<16x128xf32>, vector<16x8xf32> -> vector<16x144xf32>
    %cst_4 = arith.constant 0.000000e+00 : f32
    %9 = vector.broadcast %cst_4 : f32 to vector<1x144xf32>
    %10 = tpu.concatenate %9, %8, %9 in 0 : vector<1x144xf32>, vector<16x144xf32>, vector<1x144xf32> -> vector<18x144xf32>
    %cst_5 = arith.constant 0.000000e+00 : f32
    %11 = vector.broadcast %cst_5 : f32 to vector<16x128xf32>
    %12 = vector.extract_strided_slice %10 {offsets = [0, 0], sizes = [16, 144], strides = [1, 1]} : vector<18x144xf32> to vector<16x144xf32>
    %c0_6 = arith.constant 0 : index
    %c0_7 = arith.constant 0 : index
    %c0_8 = arith.constant 0 : index
    %13 = vector.load %arg2[%c0_6, %c0_7, %c0_8] : memref<3x144x128xf32, #tpu.memory_space<vmem>>, vector<1x144x128xf32>
    %14 = vector.shape_cast %13 : vector<1x144x128xf32> to vector<144x128xf32>
    %cst_9 = arith.constant dense<0.000000e+00> : vector<16x128xf32>
    %15 = tpu.matmul %12, %14, %cst_9 {dimension_numbers = #tpu.dot_dimension_numbers<[1], [0], [0], [1], [0, 0, 1, 1], [], []>} : vector<16x144xf32>, vector<144x128xf32>, vector<16x128xf32> -> vector<16x128xf32>
    %16 = arith.addf %11, %15 : vector<16x128xf32>
    %17 = vector.extract_strided_slice %10 {offsets = [1, 0], sizes = [16, 144], strides = [1, 1]} : vector<18x144xf32> to vector<16x144xf32>
    %c1 = arith.constant 1 : index
    %c0_10 = arith.constant 0 : index
    %c0_11 = arith.constant 0 : index
    %18 = vector.load %arg2[%c1, %c0_10, %c0_11] : memref<3x144x128xf32, #tpu.memory_space<vmem>>, vector<1x144x128xf32>
    %19 = vector.shape_cast %18 : vector<1x144x128xf32> to vector<144x128xf32>
    %cst_12 = arith.constant dense<0.000000e+00> : vector<16x128xf32>
    %20 = tpu.matmul %17, %19, %cst_12 {dimension_numbers = #tpu.dot_dimension_numbers<[1], [0], [0], [1], [0, 0, 1, 1], [], []>} : vector<16x144xf32>, vector<144x128xf32>, vector<16x128xf32> -> vector<16x128xf32>
    %21 = arith.addf %16, %20 : vector<16x128xf32>
    %22 = vector.extract_strided_slice %10 {offsets = [2, 0], sizes = [16, 144], strides = [1, 1]} : vector<18x144xf32> to vector<16x144xf32>
    %c2 = arith.constant 2 : index
    %c0_13 = arith.constant 0 : index
    %c0_14 = arith.constant 0 : index
    %23 = vector.load %arg2[%c2, %c0_13, %c0_14] : memref<3x144x128xf32, #tpu.memory_space<vmem>>, vector<1x144x128xf32>
    %24 = vector.shape_cast %23 : vector<1x144x128xf32> to vector<144x128xf32>
    %cst_15 = arith.constant dense<0.000000e+00> : vector<16x128xf32>
    %25 = tpu.matmul %22, %24, %cst_15 {dimension_numbers = #tpu.dot_dimension_numbers<[1], [0], [0], [1], [0, 0, 1, 1], [], []>} : vector<16x144xf32>, vector<144x128xf32>, vector<16x128xf32> -> vector<16x128xf32>
    %26 = arith.addf %21, %25 : vector<16x128xf32>
    %c0_16 = arith.constant 0 : index
    %c0_17 = arith.constant 0 : index
    %27 = vector.load %arg4[%c0_16, %c0_17] : memref<1x128xf32, #tpu.memory_space<vmem>>, vector<1x128xf32>
    %28 = vector.broadcast %27 : vector<1x128xf32> to vector<16x128xf32>
    %29 = arith.addf %26, %28 : vector<16x128xf32>
    %cst_18 = arith.constant 0.000000e+00 : f32
    %30 = vector.broadcast %cst_18 : f32 to vector<16x128xf32>
    %31 = arith.cmpf ogt, %29, %30 : vector<16x128xf32>
    %cst_19 = arith.constant 0.00999999977 : f32
    %32 = vector.broadcast %cst_19 : f32 to vector<16x128xf32>
    %33 = arith.mulf %32, %29 : vector<16x128xf32>
    %34 = arith.select %31, %29, %33 : vector<16x128xi1>, vector<16x128xf32>
    %cst_20 = arith.constant 0.000000e+00 : f32
    %35 = vector.broadcast %cst_20 : f32 to vector<16x8xf32>
    %36 = tpu.concatenate %35, %34, %35 in 1 : vector<16x8xf32>, vector<16x128xf32>, vector<16x8xf32> -> vector<16x144xf32>
    %cst_21 = arith.constant 0.000000e+00 : f32
    %37 = vector.broadcast %cst_21 : f32 to vector<1x144xf32>
    %38 = tpu.concatenate %37, %36, %37 in 0 : vector<1x144xf32>, vector<16x144xf32>, vector<1x144xf32> -> vector<18x144xf32>
    %cst_22 = arith.constant 0.000000e+00 : f32
    %39 = vector.broadcast %cst_22 : f32 to vector<16x128xf32>
    %40 = vector.extract_strided_slice %38 {offsets = [0, 0], sizes = [16, 144], strides = [1, 1]} : vector<18x144xf32> to vector<16x144xf32>
    %c0_23 = arith.constant 0 : index
    %c0_24 = arith.constant 0 : index
    %c0_25 = arith.constant 0 : index
    %41 = vector.load %arg3[%c0_23, %c0_24, %c0_25] : memref<3x144x128xf32, #tpu.memory_space<vmem>>, vector<1x144x128xf32>
    %42 = vector.shape_cast %41 : vector<1x144x128xf32> to vector<144x128xf32>
    %cst_26 = arith.constant dense<0.000000e+00> : vector<16x128xf32>
    %43 = tpu.matmul %40, %42, %cst_26 {dimension_numbers = #tpu.dot_dimension_numbers<[1], [0], [0], [1], [0, 0, 1, 1], [], []>} : vector<16x144xf32>, vector<144x128xf32>, vector<16x128xf32> -> vector<16x128xf32>
    %44 = arith.addf %39, %43 : vector<16x128xf32>
    %45 = vector.extract_strided_slice %38 {offsets = [1, 0], sizes = [16, 144], strides = [1, 1]} : vector<18x144xf32> to vector<16x144xf32>
    %c1_27 = arith.constant 1 : index
    %c0_28 = arith.constant 0 : index
    %c0_29 = arith.constant 0 : index
    %46 = vector.load %arg3[%c1_27, %c0_28, %c0_29] : memref<3x144x128xf32, #tpu.memory_space<vmem>>, vector<1x144x128xf32>
    %47 = vector.shape_cast %46 : vector<1x144x128xf32> to vector<144x128xf32>
    %cst_30 = arith.constant dense<0.000000e+00> : vector<16x128xf32>
    %48 = tpu.matmul %45, %47, %cst_30 {dimension_numbers = #tpu.dot_dimension_numbers<[1], [0], [0], [1], [0, 0, 1, 1], [], []>} : vector<16x144xf32>, vector<144x128xf32>, vector<16x128xf32> -> vector<16x128xf32>
    %49 = arith.addf %44, %48 : vector<16x128xf32>
    %50 = vector.extract_strided_slice %38 {offsets = [2, 0], sizes = [16, 144], strides = [1, 1]} : vector<18x144xf32> to vector<16x144xf32>
    %c2_31 = arith.constant 2 : index
    %c0_32 = arith.constant 0 : index
    %c0_33 = arith.constant 0 : index
    %51 = vector.load %arg3[%c2_31, %c0_32, %c0_33] : memref<3x144x128xf32, #tpu.memory_space<vmem>>, vector<1x144x128xf32>
    %52 = vector.shape_cast %51 : vector<1x144x128xf32> to vector<144x128xf32>
    %cst_34 = arith.constant dense<0.000000e+00> : vector<16x128xf32>
    %53 = tpu.matmul %50, %52, %cst_34 {dimension_numbers = #tpu.dot_dimension_numbers<[1], [0], [0], [1], [0, 0, 1, 1], [], []>} : vector<16x144xf32>, vector<144x128xf32>, vector<16x128xf32> -> vector<16x128xf32>
    %54 = arith.addf %49, %53 : vector<16x128xf32>
    %c0_35 = arith.constant 0 : index
    %c0_36 = arith.constant 0 : index
    %55 = vector.load %arg5[%c0_35, %c0_36] : memref<1x128xf32, #tpu.memory_space<vmem>>, vector<1x128xf32>
    %56 = vector.broadcast %55 : vector<1x128xf32> to vector<16x128xf32>
    %57 = arith.addf %54, %56 : vector<16x128xf32>
    %58 = arith.addf %57, %1 : vector<16x128xf32>
    %c0_37 = arith.constant 0 : index
    %c0_38 = arith.constant 0 : index
    %c0_39 = arith.constant 0 : index
    %59 = vector.load %arg6[%c0_37, %c0_38, %c0_39] : memref<1x16x128xf32, #tpu.memory_space<vmem>>, vector<1x16x128xf32>
    %60 = vector.shape_cast %59 : vector<1x16x128xf32> to vector<16x128xf32>
    %61 = vector.shape_cast %58 : vector<16x128xf32> to vector<1x16x128xf32>
    tpu.vector_store %arg6[%c0_37, %c0_38, %c0_39], %61 {strides = array<i32>} : memref<1x16x128xf32, #tpu.memory_space<vmem>>, vector<1x16x128xf32>,
    return
  }
  func.func @transform_0(%arg0: i32) -> (i32, i32, i32) {
    %c0_i32 = arith.constant 0 : i32
    %c0_i32_0 = arith.constant 0 : i32
    %c0_i32_1 = arith.constant 0 : i32
    return %arg0, %c0_i32, %c0_i32_0 : i32, i32, i32
  }
  func.func @transform_1(%arg0: i32) -> (i32, i32, i32) {
    %c0_i32 = arith.constant 0 : i32
    %c0_i32_0 = arith.constant 0 : i32
    %c0_i32_1 = arith.constant 0 : i32
    %c0_i32_2 = arith.constant 0 : i32
    return %c0_i32, %c0_i32_0, %c0_i32_1 : i32, i32, i32
  }
  func.func @transform_2(%arg0: i32) -> (i32, i32, i32) {
    %c0_i32 = arith.constant 0 : i32
    %c0_i32_0 = arith.constant 0 : i32
    %c0_i32_1 = arith.constant 0 : i32
    %c0_i32_2 = arith.constant 0 : i32
    return %c0_i32, %c0_i32_0, %c0_i32_1 : i32, i32, i32
  }
  func.func @transform_3(%arg0: i32) -> (i32, i32) {
    %c0_i32 = arith.constant 0 : i32
    %c0_i32_0 = arith.constant 0 : i32
    %c0_i32_1 = arith.constant 0 : i32
    return %c0_i32, %c0_i32_0 : i32, i32
  }
  func.func @transform_4(%arg0: i32) -> (i32, i32) {
    %c0_i32 = arith.constant 0 : i32
    %c0_i32_0 = arith.constant 0 : i32
    %c0_i32_1 = arith.constant 0 : i32
    return %c0_i32, %c0_i32_0 : i32, i32
  }
  func.func @transform_5(%arg0: i32) -> (i32, i32, i32) {
    %c0_i32 = arith.constant 0 : i32
    %c0_i32_0 = arith.constant 0 : i32
    %c0_i32_1 = arith.constant 0 : i32
    return %arg0, %c0_i32, %c0_i32_0 : i32, i32, i32
  }
}

</mosaic_0001>

<bundles_post_ra>
// kernel: tpu_custom_call.1
= control target key start
LH: loop header
LB: loop body
LE: loop exit
PB: predicated region body
PF: predicated region fallthrough
CT: control target
= control target key end

     0   :  { %10 = vsyncpa [#allocation3], 0  ;;  %s1867_s0 = inlined_call_operand.hbm [shape: f32[2,16,128], index: 0, kind: input, shape index: {}]   ;;  %s1868_s1 = inlined_call_operand.hbm [shape: f32[3,144,128], index: 1, kind: input, shape index: {}]   ;;  %s1869_s2 = inlined_call_operand.hbm [shape: f32[3,144,128], index: 2, kind: input, shape index: {}]   ;;  %s1870_s3 = inlined_call_operand.vmem [shape: f32[1,128], index: 3, kind: input, shape index: {}]   ;;  %s1871_s4 = inlined_call_operand.vmem [shape: f32[1,128], index: 4, kind: input, shape index: {}]   ;;  %s1872_s5 = inlined_call_operand.hbm [shape: f32[2,16,128], index: 5, kind: output, shape index: {}]  }
   0x1   :  { %12 = vsyncpa [#allocation3 + $0x1], 0 }
   0x2   :  { %13 = vsyncpa [#allocation6], 0 }
   0x3   :  { %14 = vsyncpa [#allocation4], 0 }
   0x4   :  { %16 = vsyncpa [#allocation4 + $0x1], 0  ;;  %s1426_s18 = smov 0   ;;  %s1428_s19 = smov 0  }
   0x5   :  { %s1430_s20 = smov 0   ;;  %s1432_s21 = smov 0  }
   0x6 LB: > { %s1447_s22 = sadd.s32 4294967295, %s1385_s21   ;;  %s1127_s23 = sadd.s32 4294967294, %s1385_s21   ;;  %s1385_s21 = sphi %s1432_s21, %s1897_s21   ;;  %s1381_s20 = sphi %s1430_s20, %s1896_s20   ;;  %s1377_s19 = sphi %s1428_s19, %s1895_s19   ;;  %s1373_s18 = sphi %s1426_s18, %s1894_s18  }
   0x7   : > { %p42_p0 = scmp.ne.s32.totalorder %s1377_s19, %s1373_s18  ;;  %p1873_p1 = scmp.eq.s32.totalorder %s1447_s22, 0 }
   0x8   : > { %p150_p2 = scmp.eq.s32.totalorder %s1447_s22, 1  ;;  %p156_p3 = scmp.eq.s32.totalorder %s1127_s23, 1 }
   0x9   : > { %p1456_p4 = por %p1873_p1, %p42_p0  ;;  %p1128_p5 = scmp.ge.s32.totalorder %s1385_s21, 1 }
   0xa   : > { %p1461_p6 = por %p156_p3, %p42_p0  ;;  %p163_p7 = scmp.lt.s32.totalorder %s1385_s21, 3 }
   0xb   : > { %s1878_s24 = scalar_select %p1456_p4, 1, 0 }
   0xc   : > { %s1879_s25 = scalar_select %p1461_p6, 1, 0 }
   0xd   : > { %p1466_p8 = pnand %p1128_p5, %p163_p7  ;;  %s1387_s27 = smov [#allocation5]  }
   0xe   : > { %s175_s28 = sshll.u32 %s1387_s27, 4  ;;  %s1388_s30 = smov [#allocation7]   ;;  %s176_s28 = int_to_ptr.vmem [resolvable:$true] %s175_s28 }
   0xf   : > { %s1880_s26 = scalar_select %p1466_p8, 1, 0 }
  0x10   : > { %p1177_p9 = pneg %p1466_p8  ;;  %s188_s6 = sshll.u32 %s1388_s30, 4  ;;  %s189_s6 = int_to_ptr.vmem [resolvable:$true] %s188_s6 }
  0x11   : > { %s1248_s7 = scalar_lea.vmem %s176_s28, 6912  ;;  %p1256_p5 = scmp.lt.s32.totalorder %s176_s28, %s176_s28 }
  0x12   : > { %p1475_p11 = pnand %p1177_p9, %p1873_p1  ;;  %p1249_p13 = scmp.ne.s32.totalorder %s176_s28, %s1248_s7 }
  0x13   : > { %p1257_p7 = scmp.lt.s32.totalorder %s1248_s7, %s1248_s7 }
  0x14   : > { %p1239_p12 = pneg %p1475_p11 }
  0x15   : > { %p1258_p10 = por %p1257_p7, %p1256_p5 }
  0x16   : > { %p1251_p0 = pnand %p1249_p13, %p1239_p12 }
  0x18   : > { %p1252_p3 = pneg %p1251_p0 }
  0x1a   : > { %p1259_p9 = pnand %p1258_p10, %p1252_p3 }
  0x1c   : > { %1262 = shalt.err (!%p1259_p9)
}
  0x1d   : > { %s1874_s8 = smov 128   ;;  %s1390_s9 = smov 8  }
  0x1e   : > { %1180 = dma.hbm_to_vmem [thread:$0]  (!%p1475_p11), %s1868_s1, 6912, %s176_s28, [#allocation6], %s1874_s8, %s1874_s8, %s1390_s9  }
  0x1f   : > { %s1274_s12 = scalar_lea.vmem %s189_s6, 6912  ;;  %p1282_p10 = scmp.lt.s32.totalorder %s189_s6, %s189_s6 }
  0x20   : > { %p1275_p13 = scmp.ne.s32.totalorder %s189_s6, %s1274_s12  ;;  %p1283_p3 = scmp.lt.s32.totalorder %s1274_s12, %s1274_s12 }
  0x22   : > { %p1277_p0 = pnand %p1275_p13, %p1239_p12  ;;  %p1284_p7 = por %p1283_p3, %p1282_p10 }
  0x24   : > { %p1278_p5 = pneg %p1277_p0 }
  0x26   : > { %p1285_p9 = pnand %p1284_p7, %p1278_p5 }
  0x28   : > { %1288 = shalt.err (!%p1285_p9)
}
  0x29   : > { %1183 = dma.hbm_to_vmem [thread:$0]  (!%p1475_p11), %s1869_s2, 6912, %s189_s6, [#allocation6], %s1874_s8, %s1874_s8, %s1390_s9  }
  0x2a   : > { %s1504_s15 = sadd.s32 1, %s1385_s21   ;;  %s29_s16 = sadd.s32 1, %s1381_s20 }
  0x2b   : > { %s26_s17 = ssub.s32 %s1385_s21, %s1504_s15  ;;  %p36_p12 = scmp.ne.s32.totalorder %s1381_s20, %s1377_s19 }
  0x2c   : > { %p27_p13 = scmp.eq.s32.totalorder %s26_s17, 0  ;;  %p37_p0 = scmp.eq.s32.totalorder %s1385_s21, 0 }
  0x2d   : > { %p1514_p5 = por %p150_p2, %p36_p12  ;;  %p1194_p10 = scmp.lt.s32.totalorder %s1385_s21, 2 }
  0x2e   : > { %s1520_s27 = scalar_select %p27_p13, %s1381_s20, %s29_s16  }
  0x2f   : > { %s1882_s23 = scalar_select %p1514_p5, 1, 0 }
  0x30   : > { %p38_p3 = por %p37_p0, %p36_p12  ;;  %s208_s28 = sand.u32 1, %s1381_s20  }
  0x31   : > { %s1132_s29 = sshll.u32 %s208_s28, 4  ;;  %s1163_s30 = sshll.u32 %s1385_s21, 8 }
  0x32   : > { %s1527_s10 = scalar_lea.hbm %s1867_s0, %s1163_s30  ;;  %s212_s11 = scalar_lea.vmem [#allocation2], %s1132_s29 }
  0x33   : > { %s219_s12 = sshll.u32 %s212_s11, 4  ;;  %p1531_p2 = pnand %p1194_p10, %p38_p3  ;;  %s1529_s12 = int_to_ptr.vmem [resolvable:$true] %s219_s12 }
  0x34   : > { %s1535_s14 = scalar_lea.sflag [#allocation3], %s208_s28  ;;  %s1289_s16 = scalar_lea.hbm %s1527_s10, 256 }
  0x35   : > { %p1290_p11 = scmp.ne.s32.totalorder %s1527_s10, %s1289_s16  ;;  %p1291_p7 = pneg %p1531_p2 }
  0x36   : > { %s1294_s29 = scalar_lea.hbm %s1867_s0, 512  ;;  %p1295_p13 = scmp.lt.s32.totalorder %s1527_s10, %s1867_s0 }
  0x37   : > { %p1292_p9 = pnand %p1291_p7, %p1290_p11  ;;  %p1296_p0 = scmp.lt.s32.totalorder %s1294_s29, %s1289_s16 }
  0x39   : > { %p1293_p12 = pneg %p1292_p9  ;;  %p1297_p10 = por %p1296_p0, %p1295_p13 }
  0x3b   : > { %p1298_p3 = pnand %p1297_p10, %p1293_p12 }
  0x3d   : > { %1301 = shalt.err (!%p1298_p3)
}
  0x3e   : > { %s1302_s28 = scalar_lea.vmem %s1529_s12, 256  ;;  %s1391_s11 = smov [#allocation2]  }
  0x3f   : > { %p1303_p1 = scmp.ne.s32.totalorder %s1529_s12, %s1302_s28  ;;  %s1307_s8 = sshll.u32 %s1391_s11, 4  ;;  %s1308_s8 = int_to_ptr.vmem [resolvable:$false] %s1307_s8 }
  0x40   : > { %s1309_s17 = scalar_lea.vmem %s1308_s8, 512  ;;  %p1310_p9 = scmp.lt.s32.totalorder %s1529_s12, %s1308_s8 }
  0x41   : > { %p1305_p6 = pnand %p1303_p1, %p1291_p7  ;;  %p1311_p5 = scmp.lt.s32.totalorder %s1309_s17, %s1302_s28 }
  0x43   : > { %p1306_p11 = pneg %p1305_p6  ;;  %p1312_p4 = por %p1311_p5, %p1310_p9 }
  0x45   : > { %p1313_p8 = pnand %p1312_p4, %p1306_p11 }
  0x47   : > { %1316 = shalt.err (!%p1313_p8)
}
  0x48   : > { %s1884_s16 = smov 128   ;;  %p1885_p1 = scmp.ne.s32.totalorder %s1880_s26, 0 }
  0x49   : > { %1187 = dma.hbm_to_vmem [thread:$0]  (!%p1531_p2), %s1527_s10, 256, %s1529_s12, %s1535_s14, %s1884_s16, %s1884_s16, %s1390_s9  }
  0x4a   : > { %231 = sbr.rel (%p1885_p1) target bundleno = 831 (0x33f), region = 40  ;;  %s1562_s30 = sand.u32 (!%p1885_p1), 1, %s1377_s19  }
  0x4b   : > { %s1136_s8 = sshll.u32 (!%p1885_p1), %s1562_s30, 4  ;;  %s234_s29 = scalar_lea.sflag (!%p1885_p1), [#allocation3], %s1562_s30 }
  0x4c   : > { %s237_s13 = scalar_lea.vmem (!%p1885_p1), [#allocation2], %s1136_s8  ;;  %p1886_p4 = scmp.ne.s32.totalorder (!%p1885_p1), %s1878_s24, 0 }
  0x4f   : > { %1360 = dma.done.wait (%p1886_p4), %s234_s29, 256  }
  0x50   : > { %1362 = vsyncadd (%p1886_p4), %s234_s29, 4294967040  ;;  %p1887_p6 = scmp.eq.s32.totalorder %s1447_s22, 0 }
  0x52   : > { %1364 = dma.done.wait (%p1887_p6), [#allocation6], 13824   ;;  %p1888_p8 = pmov %p1887_p6 }
  0x53   : > { %v1392_v0 = vmov 0.0   ;;  %v1578_v1 = vld [vmem:[%s237_s13] sm:$0xff]  ;;  %v1580_v2 = vld [vmem:[%s237_s13 + $0x8] sm:$0xff]  ;;  %s1393_s24 = smov 8   ;;  %vm288_vm2 = vcmask 64512   ;;  %vm297_vm3 = vcmask 1040384  }
  0x54   : > { %1366 = vsyncadd (%p1888_p8), [#allocation6], 4294953472  ;;  %451 = vmatprep.subr.mxu1 %v1392_v0  ;;  %372 = vmatprep.subr.mxu0 %v1392_v0  ;;  %v328_v3 = vld [vmem:[#allocation5 + $0x78] sm:$0xff]  ;;  %vm274_vm0 = vcmp.gt.f32.partialorder %v1578_v1, 0.0  ;;  %v276_v4 = vmul.f32 0.01, %v1578_v1 }
  0x55   : > { %v277_v5 = vmul.f32 0.01, %v1580_v2  ;;  %452 = vmatpush1.msra.mxu1 %v328_v3  ;;  %vm275_vm1 = vcmp.gt.f32.partialorder %v1580_v2, 0.0  ;;  %v327_v6 = vld [vmem:[#allocation5 + $0x70] sm:$0xff]  ;;  %v326_v7 = vld [vmem:[#allocation5 + $0x68] sm:$0xff]  ;;  %v346_v10 = vld [vmem:[#allocation5 + $0x100] sm:$0xff] }
  0x56   : > { %453 = vmatprep.subr.mxu1 %v1392_v0  ;;  %v347_v8 = vld [vmem:[#allocation5 + $0x108] sm:$0xff]  ;;  %v278_v9 = vsel %vm274_vm0, %v1578_v1, %v276_v4  ;;  %v325_v11 = vld [vmem:[#allocation5 + $0x60] sm:$0xff]  ;;  %v324_v13 = vld [vmem:[#allocation5 + $0x58] sm:$0xff]  ;;  %vm367_vm4 = vcmask 130048   ;;  %vm354_vm6 = vcmask 1046528   ;;  %vm545_vm7 = vcmask 1045504  }
  0x57   : > { %454 = vmatpush1.msra.mxu1 %v327_v6  ;;  %373 = vmatpush1.msra.mxu0 %v347_v8  ;;  %v279_v12 = vsel %vm275_vm1, %v1580_v2, %v277_v5  ;;  %v345_v14 = vld [vmem:[#allocation5 + $0xf8] sm:$0xff]  ;;  %v323_v15 = vld [vmem:[#allocation5 + $0x50] sm:$0xff]  ;;  %v322_v17 = vld [vmem:[#allocation5 + $0x48] sm:$0xff]  ;;  %s271_s14 = scalar_lea.vmem [#allocation8], %s1136_s8  ;;  %s1164_s7 = sshll.u32 %s1447_s22, 8 }
  0x58   : > { %282 = vrot.lane.b32.xlu0 %v278_v9, %s1393_s24  ;;  %455 = vmatprep.subr.mxu1 %v1392_v0  ;;  %v344_v16 = vld [vmem:[#allocation5 + $0xf0] sm:$0xff]  ;;  %v343_v18 = vld [vmem:[#allocation5 + $0xe8] sm:$0xff]  ;;  %v321_v19 = vld [vmem:[#allocation5 + $0x40] sm:$0xff]  ;;  %s1035_s6 = sshll.u32 %s271_s14, 4  ;;  %s1823_s17 = scalar_lea.hbm %s1872_s5, %s1164_s7  ;;  %s1817_s6 = int_to_ptr.vmem [resolvable:$true] %s1035_s6 }
  0x59   : > { %456 = vmatpush1.msra.mxu1 %v326_v7  ;;  %374 = vmatprep.subr.mxu0 %v1392_v0  ;;  %v342_v20 = vld [vmem:[#allocation5 + $0xe0] sm:$0xff]  ;;  %v320_v21 = vld [vmem:[#allocation5 + $0x38] sm:$0xff]  ;;  %v319_v23 = vld [vmem:[#allocation5 + $0x30] sm:$0xff]  ;;  %s1022_s16 = scalar_lea.sflag [#allocation4], %s1562_s30  ;;  %s1317_s8 = scalar_lea.vmem %s1817_s6, 256 }
  0x5a   : > { %457 = vmatprep.subr.mxu1 %v1392_v0  ;;  %375 = vmatpush1.msra.mxu0 %v346_v10  ;;  %v341_v22 = vld [vmem:[#allocation5 + $0xd8] sm:$0xff]  ;;  %v340_v24 = vld [vmem:[#allocation5 + $0xd0] sm:$0xff]  ;;  %v318_v25 = vld [vmem:[#allocation5 + $0x28] sm:$0xff]  ;;  %p1318_p5 = scmp.ne.s32.totalorder %s1817_s6, %s1317_s8  ;;  %p1891_p2 = scmp.ne.s32.totalorder %s1882_s23, 0 }
  0x5b   : > { %458 = vmatpush1.msra.mxu1 %v325_v11  ;;  %376 = vmatprep.subr.mxu0 %v1392_v0  ;;  %v339_v26 = vld [vmem:[#allocation5 + $0xc8] sm:$0xff]  ;;  %v317_v27 = vld [vmem:[#allocation5 + $0x20] sm:$0xff]  ;;  %v316_v29 = vld [vmem:[#allocation5 + $0x18] sm:$0xff]  ;;  %s1394_s22 = smov [#allocation8]  }
  0x5c   : > { %284 = vrot.lane.b32.xlu0 %v279_v12, %s1393_s24  ;;  %459 = vmatprep.subr.mxu1 %v1392_v0  ;;  %v338_v28 = vld [vmem:[#allocation5 + $0xc0] sm:$0xff]  ;;  %v337_v30 = vld [vmem:[#allocation5 + $0xb8] sm:$0xff]  ;;  %v315_v31 = vld [vmem:[#allocation5 + $0x10] sm:$0xff]  ;;  %p1319_p7 = pnand %p1318_p5, %p1891_p2  ;;  %s1321_s29 = sshll.u32 %s1394_s22, 4  ;;  %s1322_s29 = int_to_ptr.vmem [resolvable:$false] %s1321_s29 }
  0x5d   : > { %460 = vmatpush1.msra.mxu1 %v324_v13  ;;  %377 = vmatpush1.msra.mxu0 %v345_v14  ;;  %v336_v32 = vld [vmem:[#allocation5 + $0xb0] sm:$0xff]  ;;  %v314_v33 = vld [vmem:[#allocation5 + $0x8] sm:$0xff]  ;;  %v313_v35 = vld [vmem:[#allocation5] sm:$0xff]  ;;  %s1323_s13 = scalar_lea.vmem %s1322_s29, 512  ;;  %p1324_p13 = scmp.lt.s32.totalorder %s1817_s6, %s1322_s29 }
  0x5e   : > { %461 = vmatprep.subr.mxu1 %v1392_v0  ;;  %378 = vmatprep.subr.mxu0 %v1392_v0  ;;  %v335_v34 = vld [vmem:[#allocation5 + $0xa8] sm:$0xff]  ;;  %v334_v36 = vld [vmem:[#allocation5 + $0xa0] sm:$0xff]  ;;  %v333_v38 = vld [vmem:[#allocation5 + $0x98] sm:$0xff]  ;;  %p1320_p12 = pneg %p1319_p7  ;;  %p1325_p0 = scmp.lt.s32.totalorder %s1323_s13, %s1317_s8 }
  0x5f   : > { %462 = vmatpush1.msra.mxu1 %v323_v15  ;;  %379 = vmatpush1.msra.mxu0 %v344_v16  ;;  %v330_v37 = vld [vmem:[#allocation5 + $0x88] sm:$0xff]  ;;  %v329_v39 = vld [vmem:[#allocation5 + $0x80] sm:$0xff]  ;;  %v332_v40 = vld [vmem:[#allocation5 + $0x90] sm:$0xff] }
  0x60   : > { %463 = vmatprep.subr.mxu1 %v1392_v0  ;;  %380 = vmatprep.subr.mxu0 %v1392_v0  ;;  %v349_v41 = vld [vmem:[#allocation5 + $0x118] sm:$0xff]  ;;  %v348_v42 = vld [vmem:[#allocation5 + $0x110] sm:$0xff]  ;;  %vm1629_vm5 = vmneg %vm297_vm3  ;;  %p1326_p10 = por %p1325_p0, %p1324_p13 }
  0x61   : > { %464 = vmatpush1.msra.mxu1 %v322_v17  ;;  %381 = vmatpush1.msra.mxu0 %v343_v18  ;;  %v542_v6 = vld [vmem:[#allocation5 + $0x198] sm:$0xff]  ;;  %v541_v10 = vld [vmem:[#allocation5 + $0x190] sm:$0xff]  ;;  %v540_v12 = vld [vmem:[#allocation5 + $0x188] sm:$0xff] }
  0x62   : > { %465 = vmatprep.subr.mxu1 %v1392_v0  ;;  %382 = vmatprep.subr.mxu0 %v1392_v0  ;;  %v539_v15 = vld [vmem:[#allocation5 + $0x180] sm:$0xff]  ;;  %v538_v16 = vld [vmem:[#allocation5 + $0x178] sm:$0xff]  ;;  %v537_v17 = vld [vmem:[#allocation5 + $0x170] sm:$0xff]  ;;  %p1327_p3 = pnand %p1326_p10, %p1320_p12 }
  0x63   : > { %466 = vmatpush1.msra.mxu1 %v321_v19  ;;  %383 = vmatpush1.msra.mxu0 %v342_v20  ;;  %v536_v18 = vld [vmem:[#allocation5 + $0x168] sm:$0xff]  ;;  %v535_v19 = vld [vmem:[#allocation5 + $0x160] sm:$0xff]  ;;  %v534_v20 = vld [vmem:[#allocation5 + $0x158] sm:$0xff] }
  0x64   : > { %467 = vmatprep.subr.mxu1 %v1392_v0  ;;  %384 = vmatprep.subr.mxu0 %v1392_v0 }
  0x65   : > { %468 = vmatpush1.msra.mxu1 %v320_v21  ;;  %385 = vmatpush1.msra.mxu0 %v341_v22  ;;  %v533_v21 = vld [vmem:[#allocation5 + $0x150] sm:$0xff]  ;;  %v532_v22 = vld [vmem:[#allocation5 + $0x148] sm:$0xff] }
  0x66   : > { %469 = vmatprep.subr.mxu1 %v1392_v0  ;;  %386 = vmatprep.subr.mxu0 %v1392_v0 }
  0x67   : > { %470 = vmatpush1.msra.mxu1 %v319_v23  ;;  %387 = vmatpush1.msra.mxu0 %v340_v24  ;;  %v531_v23 = vld [vmem:[#allocation5 + $0x140] sm:$0xff]  ;;  %v530_v24 = vld [vmem:[#allocation5 + $0x138] sm:$0xff] }
  0x68   : > { %471 = vmatprep.subr.mxu1 %v1392_v0  ;;  %388 = vmatprep.subr.mxu0 %v1392_v0 }
  0x69   : > { %472 = vmatpush1.msra.mxu1 %v318_v25  ;;  %389 = vmatpush1.msra.mxu0 %v339_v26  ;;  %v529_v25 = vld [vmem:[#allocation5 + $0x130] sm:$0xff]  ;;  %v528_v26 = vld [vmem:[#allocation5 + $0x128] sm:$0xff] }
  0x6a   : > { %473 = vmatprep.subr.mxu1 %v1392_v0  ;;  %390 = vmatprep.subr.mxu0 %v1392_v0 }
  0x6b   : > { %474 = vmatpush1.msra.mxu1 %v317_v27  ;;  %391 = vmatpush1.msra.mxu0 %v338_v28  ;;  %v527_v27 = vld [vmem:[#allocation5 + $0x120] sm:$0xff]  ;;  %v544_v28 = vld [vmem:[#allocation5 + $0x1a8] sm:$0xff] }
  0x6c   : > { %475 = vmatprep.subr.mxu1 %v1392_v0  ;;  %392 = vmatprep.subr.mxu0 %v1392_v0 }
  0x6d   : > { %476 = vmatpush1.msra.mxu1 %v316_v29  ;;  %393 = vmatpush1.msra.mxu0 %v337_v30 }
  0x6e   : > { %477 = vmatprep.subr.mxu1 %v1392_v0  ;;  %394 = vmatprep.subr.mxu0 %v1392_v0 }
  0x6f   : > { %478 = vmatpush1.msra.mxu1 %v315_v31  ;;  %395 = vmatpush1.msra.mxu0 %v336_v32  ;;  %v543_v31 = vld [vmem:[#allocation5 + $0x1a0] sm:$0xff] }
  0x70   : > { %479 = vmatprep.subr.mxu1 %v1392_v0  ;;  %396 = vmatprep.subr.mxu0 %v1392_v0 }
  0x71   : > { %480 = vmatpush1.msra.mxu1 %v314_v33  ;;  %397 = vmatpush1.msra.mxu0 %v335_v34 }
  0x72   : > { %481 = vmatprep.subr.mxu1 %v1392_v0  ;;  %398 = vmatprep.subr.mxu0 %v1392_v0 }
  0x73   : > { %482 = vmatpush1.msra.mxu1 %v313_v35  ;;  %399 = vmatpush1.msra.mxu0 %v334_v36 }
  0x74   : > { %511 = vmatprep.subr.mxu1 %v1392_v0  ;;  %400 = vmatprep.subr.mxu0 %v1392_v0 }
  0x75   : > { %512 = vmatpush2.msra.mxu1 %v330_v37  ;;  %401 = vmatpush1.msra.mxu0 %v333_v38  ;;  %v700_v37 = vld [vmem:[#allocation7 + $0x78] sm:$0xff]  ;;  %v699_v38 = vld [vmem:[#allocation7 + $0x70] sm:$0xff] }
  0x76   : > { %513 = vmatprep.subr.mxu1 %v1392_v0  ;;  %402 = vmatprep.subr.mxu0 %v1392_v0 }
  0x77   : > { %514 = vmatpush2.msra.mxu1 %v329_v39  ;;  %403 = vmatpush1.msra.mxu0 %v332_v40  ;;  %v719_v39 = vld [vmem:[#allocation7 + $0x108] sm:$0xff]  ;;  %v718_v40 = vld [vmem:[#allocation7 + $0x100] sm:$0xff] }
  0x78   : > { %432 = vmatprep.subr.mxu0 %v1392_v0  ;;  %742 = vmatprep.subr.mxu1 %v1392_v0 }
  0x79   : > { %433 = vmatpush2.msra.mxu0 %v349_v41  ;;  %v698_v41 = vld [vmem:[#allocation7 + $0x68] sm:$0xff] }
  0x7a   : > { %434 = vmatprep.subr.mxu0 %v1392_v0 }
  0x7b   : > { %435 = vmatpush2.msra.mxu0 %v348_v42  ;;  %v717_v42 = vld [vmem:[#allocation7 + $0xf8] sm:$0xff] }
  0x7c   : > { %562 = vmatprep.subr.mxu0 %v1392_v0 }
  0xca   : > { %v283_v43 = vpop.permute.xlu0 %282 }
  0xcb   : > { %v289_v44 = vsel %vm288_vm2, 0.0, %v283_v43  ;;  %v291_v45 = vsel %vm288_vm2, %v283_v43, 0.0  ;;  %v697_v43 = vld [vmem:[#allocation7 + $0x60] sm:$0xff] }
  0xcc   : > { %v298_v46 = vrot.slane %v289_v44, 7  ;;  %v299_v47 = vrot.slane %v291_v45, 7  ;;  %v716_v44 = vld [vmem:[#allocation7 + $0xf0] sm:$0xff]  ;;  %v696_v45 = vld [vmem:[#allocation7 + $0x58] sm:$0xff] }
  0xce   : > { %v285_v49 = vpop.permute.xlu0 %284  ;;  %v310_v50 = vsel %vm297_vm3, 0.0, %v299_v47  ;;  %v1638_v53 = vsel %vm297_vm3, 0.0, %v298_v46 }
  0xcf   : > { %v290_v51 = vsel %vm288_vm2, 0.0, %v285_v49  ;;  %v292_v52 = vsel %vm288_vm2, %v285_v49, 0.0  ;;  %1142 = vmatprep.mubr.msk.f32.mxu1 %vm367_vm4, %v310_v50  ;;  %v358_v59 = vrot.slane %v310_v50, 1  ;;  %v355_v60 = vrot.slane %v1638_v53, 1  ;;  %v714_v49 = vld [vmem:[#allocation7 + $0xe0] sm:$0xff] }
  0xd0   : > { %v300_v54 = vrot.slane %v290_v51, 7  ;;  %v302_v55 = vrot.slane %v292_v52, 7  ;;  %1144 = vmatmul.mubr.msk.f32.vlgmr.msra.gmra.mxu1 %vm1629_vm5, %v298_v46  ;;  %v549_v11 = vrot.slane %v310_v50, 2  ;;  %v546_v32 = vrot.slane %v1638_v53, 2  ;;  %v694_v50 = vld [vmem:[#allocation7 + $0x48] sm:$0xff]  ;;  %v713_v51 = vld [vmem:[#allocation7 + $0xd8] sm:$0xff] }
  0xd1   : > { %743 = vmatpush1.msra.mxu1 %v719_v39  ;;  %v693_v52 = vld [vmem:[#allocation7 + $0x40] sm:$0xff]  ;;  %v712_v53 = vld [vmem:[#allocation7 + $0xd0] sm:$0xff] }
  0xd2   : > { %v1643_v56 = vsel %vm297_vm3, %v302_v55, 0.0  ;;  %v1646_v57 = vsel %vm297_vm3, %v299_v47, %v302_v55  ;;  %v1649_v58 = vsel %vm297_vm3, %v298_v46, %v300_v54  ;;  %v1655_v61 = vsel %vm297_vm3, %v300_v54, 0.0  ;;  %744 = vmatprep.subr.mxu1 %v1392_v0  ;;  %v715_v46 = vld [vmem:[#allocation7 + $0xe8] sm:$0xff]  ;;  %v695_v47 = vld [vmem:[#allocation7 + $0x50] sm:$0xff]  ;;  %v692_v54 = vld [vmem:[#allocation7 + $0x38] sm:$0xff] }
  0xd3   : > { %1145 = vmatprep.mubr.msk.f32.mxu1 %vm367_vm4, %v1646_v57  ;;  %v363_v62 = vrot.slane %v1643_v56, 1  ;;  %v356_v63 = vrot.slane %v1649_v58, 1  ;;  %v359_v3 = vrot.slane %v1646_v57, 1  ;;  %v361_v7 = vrot.slane %v1655_v61, 1  ;;  %745 = vmatpush1.msra.mxu1 %v718_v40  ;;  %v711_v55 = vld [vmem:[#allocation7 + $0xc8] sm:$0xff] }
  0xd4   : > { %521 = vmatmul.mubr.f32.gmra.mxu1 %v1649_v58  ;;  %v550_v8 = vrot.slane %v1646_v57, 2  ;;  %v547_v29 = vrot.slane %v1649_v58, 2  ;;  %v554_v30 = vrot.slane %v1643_v56, 2  ;;  %v552_v33 = vrot.slane %v1655_v61, 2  ;;  %746 = vmatprep.subr.mxu1 %v1392_v0  ;;  %v691_v56 = vld [vmem:[#allocation7 + $0x30] sm:$0xff]  ;;  %v710_v57 = vld [vmem:[#allocation7 + $0xc0] sm:$0xff] }
  0xd5   : > { %v360_v4 = vsel %vm354_vm6, %v358_v59, %v359_v3  ;;  %v357_v5 = vsel %vm354_vm6, %v355_v60, %v356_v63  ;;  %v364_v9 = vsel %vm354_vm6, %v359_v3, %v363_v62  ;;  %v362_v13 = vsel %vm354_vm6, %v356_v63, %v361_v7  ;;  %747 = vmatpush1.msra.mxu1 %v717_v42  ;;  %v690_v58 = vld [vmem:[#allocation7 + $0x28] sm:$0xff]  ;;  %v709_v59 = vld [vmem:[#allocation7 + $0xb8] sm:$0xff]  ;;  %v689_v60 = vld [vmem:[#allocation7 + $0x20] sm:$0xff] }
  0xd6   : > { %1140 = vmatprep.mubr.msk.f32.mxu0 %vm367_vm4, %v360_v4  ;;  %v551_v14 = vsel %vm545_vm7, %v549_v11, %v550_v8  ;;  %v548_v34 = vsel %vm545_vm7, %v546_v32, %v547_v29  ;;  %v555_v35 = vsel %vm545_vm7, %v550_v8, %v554_v30  ;;  %v553_v36 = vsel %vm545_vm7, %v547_v29, %v552_v33  ;;  %v708_v61 = vld [vmem:[#allocation7 + $0xb0] sm:$0xff]  ;;  %v688_v62 = vld [vmem:[#allocation7 + $0x18] sm:$0xff]  ;;  %v686_v3 = vld [vmem:[#allocation7 + $0x8] sm:$0xff] }
  0xd7   : > { %437 = vmatmul.mubr.f32.vlgmr.msra.gmra.mxu0 %v357_v5  ;;  %748 = vmatprep.subr.mxu1 %v1392_v0  ;;  %v687_v63 = vld [vmem:[#allocation7 + $0x10] sm:$0xff] }
  0xd8   : > { %563 = vmatpush1.msra.mxu0 %v542_v6  ;;  %1141 = vmatprep.mubr.msk.f32.mxu0 %vm367_vm4, %v364_v9 }
  0xd9   : > { %564 = vmatprep.subr.mxu0 %v1392_v0  ;;  %749 = vmatpush1.msra.mxu1 %v716_v44 }
  0xda   : > { %565 = vmatpush1.msra.mxu0 %v541_v10  ;;  %750 = vmatprep.subr.mxu1 %v1392_v0 }
  0xdb   : > { %566 = vmatprep.subr.mxu0 %v1392_v0  ;;  %442 = vmatmul.mubr.f32.gmra.mxu0 %v362_v13  ;;  %v685_v13 = vld [vmem:[#allocation7] sm:$0xff] }
  0xdc   : > { %567 = vmatpush1.msra.mxu0 %v540_v12  ;;  %1146 = vmatprep.mubr.msk.f32.mxu0 %vm367_vm4, %v551_v14  ;;  %v707_v12 = vld [vmem:[#allocation7 + $0xa8] sm:$0xff]  ;;  %v706_v14 = vld [vmem:[#allocation7 + $0xa0] sm:$0xff] }
  0xdd   : > { %568 = vmatprep.subr.mxu0 %v1392_v0  ;;  %751 = vmatpush1.msra.mxu1 %v715_v46 }
  0xde   : > { %569 = vmatpush1.msra.mxu0 %v539_v15  ;;  %752 = vmatprep.subr.mxu1 %v1392_v0  ;;  %v702_v15 = vld [vmem:[#allocation7 + $0x88] sm:$0xff] }
  0xdf   : > { %570 = vmatprep.subr.mxu0 %v1392_v0  ;;  %753 = vmatpush1.msra.mxu1 %v714_v49 }
  0xe0   : > { %571 = vmatpush1.msra.mxu0 %v538_v16  ;;  %754 = vmatprep.subr.mxu1 %v1392_v0  ;;  %v705_v16 = vld [vmem:[#allocation7 + $0x98] sm:$0xff] }
  0xe1   : > { %572 = vmatprep.subr.mxu0 %v1392_v0  ;;  %755 = vmatpush1.msra.mxu1 %v713_v51 }
  0xe2   : > { %573 = vmatpush1.msra.mxu0 %v537_v17  ;;  %756 = vmatprep.subr.mxu1 %v1392_v0  ;;  %v701_v17 = vld [vmem:[#allocation7 + $0x80] sm:$0xff] }
  0xe3   : > { %574 = vmatprep.subr.mxu0 %v1392_v0  ;;  %757 = vmatpush1.msra.mxu1 %v712_v53 }
  0xe4   : > { %575 = vmatpush1.msra.mxu0 %v536_v18  ;;  %758 = vmatprep.subr.mxu1 %v1392_v0 }
  0xe5   : > { %576 = vmatprep.subr.mxu0 %v1392_v0  ;;  %759 = vmatpush1.msra.mxu1 %v711_v55 }
  0xe6   : > { %577 = vmatpush1.msra.mxu0 %v535_v19  ;;  %760 = vmatprep.subr.mxu1 %v1392_v0 }
  0xe7   : > { %578 = vmatprep.subr.mxu0 %v1392_v0  ;;  %761 = vmatpush1.msra.mxu1 %v710_v57 }
  0xe8   : > { %579 = vmatpush1.msra.mxu0 %v534_v20  ;;  %762 = vmatprep.subr.mxu1 %v1392_v0  ;;  %v1148_v20 = vld [vmem:[%s1870_s3] ss:$0 sm:$0xff] }
  0xe9   : > { %580 = vmatprep.subr.mxu0 %v1392_v0  ;;  %763 = vmatpush1.msra.mxu1 %v709_v59  ;;  %v912_v59 = vld [vmem:[#allocation7 + $0x198] sm:$0xff] }
  0xea   : > { %581 = vmatpush1.msra.mxu0 %v533_v21  ;;  %764 = vmatprep.subr.mxu1 %v1392_v0 }
  0xeb   : > { %582 = vmatprep.subr.mxu0 %v1392_v0  ;;  %765 = vmatpush1.msra.mxu1 %v708_v61 }
  0xec   : > { %583 = vmatpush1.msra.mxu0 %v532_v22  ;;  %766 = vmatprep.subr.mxu1 %v1392_v0  ;;  %v704_v22 = vld [vmem:[#allocation7 + $0x90] sm:$0xff] }
  0xed   : > { %584 = vmatprep.subr.mxu0 %v1392_v0  ;;  %767 = vmatpush1.msra.mxu1 %v707_v12  ;;  %v904_v12 = vld [vmem:[#allocation7 + $0x158] sm:$0xff] }
  0xee   : > { %585 = vmatpush1.msra.mxu0 %v531_v23  ;;  %768 = vmatprep.subr.mxu1 %v1392_v0 }
  0xef   : > { %586 = vmatprep.subr.mxu0 %v1392_v0  ;;  %769 = vmatpush1.msra.mxu1 %v706_v14  ;;  %v902_v14 = vld [vmem:[#allocation7 + $0x148] sm:$0xff] }
  0xf0   : > { %587 = vmatpush1.msra.mxu0 %v530_v24  ;;  %770 = vmatprep.subr.mxu1 %v1392_v0 }
  0xf1   : > { %588 = vmatprep.subr.mxu0 %v1392_v0  ;;  %771 = vmatpush1.msra.mxu1 %v705_v16  ;;  %v900_v16 = vld [vmem:[#allocation7 + $0x138] sm:$0xff] }
  0xf2   : > { %589 = vmatpush1.msra.mxu0 %v529_v25  ;;  %772 = vmatprep.subr.mxu1 %v1392_v0 }
  0xf3   : > { %590 = vmatprep.subr.mxu0 %v1392_v0  ;;  %773 = vmatpush1.msra.mxu1 %v704_v22 }
  0xf4   : > { %591 = vmatpush1.msra.mxu0 %v528_v26  ;;  %802 = vmatprep.subr.mxu1 %v1392_v0  ;;  %v721_v26 = vld [vmem:[#allocation7 + $0x118] sm:$0xff] }
  0xf5   : > { %592 = vmatprep.subr.mxu0 %v1392_v0  ;;  %803 = vmatpush2.msra.mxu1 %v721_v26 }
  0xf6   : > { %593 = vmatpush1.msra.mxu0 %v527_v27  ;;  %804 = vmatprep.subr.mxu1 %v1392_v0 }
  0xf7   : > { %622 = vmatprep.subr.mxu0 %v1392_v0 }
  0xf8   : > { %623 = vmatpush2.msra.mxu0 %v544_v28  ;;  %v720_v28 = vld [vmem:[#allocation7 + $0x110] sm:$0xff] }
  0xf9   : > { %624 = vmatprep.subr.mxu0 %v1392_v0  ;;  %805 = vmatpush2.msra.mxu1 %v720_v28 }
  0xfa   : > { %625 = vmatpush2.msra.mxu0 %v543_v31  ;;  %931 = vmatprep.subr.mxu1 %v1392_v0 }
  0xfb   : > { %627 = vmatmul.mubr.f32.vlgmr.msra.gmra.mxu0 %v548_v34  ;;  %821 = vmatprep.subr.mxu0 %v1392_v0 }
  0xfc   : > { %1147 = vmatprep.mubr.msk.f32.mxu0 %vm367_vm4, %v555_v35  ;;  %822 = vmatpush1.msra.mxu0 %v700_v37 }
  0xfd   : > { %823 = vmatprep.subr.mxu0 %v1392_v0 }
  0xfe   : > { %824 = vmatpush1.msra.mxu0 %v699_v38 }
  0xff   : > { %632 = vmatmul.mubr.f32.gmra.mxu0 %v553_v36  ;;  %825 = vmatprep.subr.mxu0 %v1392_v0 }
 0x100   : > { %826 = vmatpush1.msra.mxu0 %v698_v41 }
 0x101   : > { %827 = vmatprep.subr.mxu0 %v1392_v0 }
 0x102   : > { %828 = vmatpush1.msra.mxu0 %v697_v43 }
 0x103   : > { %829 = vmatprep.subr.mxu0 %v1392_v0 }
 0x104   : > { %830 = vmatpush1.msra.mxu0 %v696_v45 }
 0x105   : > { %831 = vmatprep.subr.mxu0 %v1392_v0 }
 0x106   : > { %832 = vmatpush1.msra.mxu0 %v695_v47 }
 0x107   : > { %833 = vmatprep.subr.mxu0 %v1392_v0 }
 0x108   : > { %834 = vmatpush1.msra.mxu0 %v694_v50 }
 0x109   : > { %835 = vmatprep.subr.mxu0 %v1392_v0 }
 0x10a   : > { %836 = vmatpush1.msra.mxu0 %v693_v52 }
 0x10b   : > { %837 = vmatprep.subr.mxu0 %v1392_v0 }
 0x10c   : > { %838 = vmatpush1.msra.mxu0 %v692_v54 }
 0x10d   : > { %839 = vmatprep.subr.mxu0 %v1392_v0 }
 0x10e   : > { %840 = vmatpush1.msra.mxu0 %v691_v56 }
 0x10f   : > { %841 = vmatprep.subr.mxu0 %v1392_v0 }
 0x110   : > { %842 = vmatpush1.msra.mxu0 %v690_v58 }
 0x111   : > { %843 = vmatprep.subr.mxu0 %v1392_v0 }
 0x112   : > { %844 = vmatpush1.msra.mxu0 %v689_v60 }
 0x113   : > { %845 = vmatprep.subr.mxu0 %v1392_v0 }
 0x114   : > { %846 = vmatpush1.msra.mxu0 %v688_v62 }
 0x115   : > { %847 = vmatprep.subr.mxu0 %v1392_v0 }
 0x116   : > { %848 = vmatpush1.msra.mxu0 %v687_v63  ;;  %v911_v63 = vld [vmem:[#allocation7 + $0x190] sm:$0xff] }
 0x117   : > { %849 = vmatprep.subr.mxu0 %v1392_v0 }
 0x118   : > { %850 = vmatpush1.msra.mxu0 %v686_v3 }
 0x119   : > { %851 = vmatprep.subr.mxu0 %v1392_v0 }
 0x11a   : > { %852 = vmatpush1.msra.mxu0 %v685_v13  ;;  %v903_v13 = vld [vmem:[#allocation7 + $0x150] sm:$0xff] }
 0x11b   : > { %881 = vmatprep.subr.mxu0 %v1392_v0 }
 0x11c   : > { %882 = vmatpush2.msra.mxu0 %v702_v15  ;;  %v901_v15 = vld [vmem:[#allocation7 + $0x140] sm:$0xff] }
 0x11d   : > { %883 = vmatprep.subr.mxu0 %v1392_v0 }
 0x11e   : > { %884 = vmatpush2.msra.mxu0 %v701_v17  ;;  %v899_v17 = vld [vmem:[#allocation7 + $0x130] sm:$0xff] }
 0x190   : > { %v517_v4 = vpop.f32.mrf.mxu1 }
 0x192   : > { %v519_v5 = vpop.f32.mrf.mxu1 }
 0x194   : > { %v522_v6 = vpop.f32.mrf.mxu1 }
 0x196   : > { %v524_v7 = vpop.f32.mrf.mxu1 }
 0x197   : > { %v438_v8 = vpop.f32.mrf.mxu0  ;;  %v909_v7 = vld [vmem:[#allocation7 + $0x180] sm:$0xff] }
 0x198   : > { %v518_v18 = vadd.f32 %v517_v4, %v438_v8  ;;  %v910_v4 = vld [vmem:[#allocation7 + $0x188] sm:$0xff]  ;;  %v908_v8 = vld [vmem:[#allocation7 + $0x178] sm:$0xff] }
 0x199   : > { %v440_v9 = vpop.f32.mrf.mxu0 }
 0x19a   : > { %v907_v9 = vld [vmem:[#allocation7 + $0x170] sm:$0xff] }
 0x19b   : > { %v443_v10 = vpop.f32.mrf.mxu0 }
 0x19c   : > { %v523_v24 = vadd.f32 %v522_v6, %v443_v10  ;;  %v906_v10 = vld [vmem:[#allocation7 + $0x168] sm:$0xff] }
 0x19d   : > { %v445_v11 = vpop.f32.mrf.mxu0 }
 0x19e   : > { %v905_v11 = vld [vmem:[#allocation7 + $0x160] sm:$0xff] }
 0x1bb   : > { %v628_v19 = vpop.f32.mrf.mxu0 }
 0x1bc   : > { %v637_v21 = vadd.f32 %v628_v19, %v518_v18  ;;  %v898_v18 = vld [vmem:[#allocation7 + $0x128] sm:$0xff]  ;;  %v897_v19 = vld [vmem:[#allocation7 + $0x120] sm:$0xff] }
 0x1bd   : > { %v630_v23 = vpop.f32.mrf.mxu0 }
 0x1be   : > { %v646_v25 = vadd.f32 %v1148_v20, %v637_v21  ;;  %v913_v23 = vld [vmem:[#allocation7 + $0x1a0] sm:$0xff] }
 0x1bf   : > { %v633_v27 = vpop.f32.mrf.mxu0 }
 0x1c0   : > { %v638_v29 = vadd.f32 %v633_v27, %v523_v24  ;;  %vm648_vm8 = vcmp.gt.f32.partialorder %v646_v25, 0.0  ;;  %v650_v30 = vmul.f32 0.01, %v646_v25 }
 0x1c1   : > { %v635_v31 = vpop.f32.mrf.mxu0 }
 0x1c2   : > { %v647_v32 = vadd.f32 %v1148_v20, %v638_v29  ;;  %v652_v33 = vsel %vm648_vm8, %v646_v25, %v650_v30  ;;  %v914_v20 = vld [vmem:[#allocation7 + $0x1a8] sm:$0xff] }
 0x1c3   : > { %656 = vrot.lane.b32.xlu1 %v652_v33, %s1393_s24 }
 0x1c4   : > { %vm649_vm9 = vcmp.gt.f32.partialorder %v647_v32, 0.0  ;;  %v651_v34 = vmul.f32 0.01, %v647_v32 }
 0x1c6   : > { %v653_v35 = vsel %vm649_vm9, %v647_v32, %v651_v34 }
 0x1c7   : > { %658 = vrot.lane.b32.xlu1 %v653_v35, %s1393_s24 }
 0x235   : > { %v657_v36 = vpop.permute.xlu1 %656 }
 0x236   : > { %v662_v37 = vsel %vm288_vm2, 0.0, %v657_v36  ;;  %v664_v38 = vsel %vm288_vm2, %v657_v36, 0.0 }
 0x237   : > { %v670_v39 = vrot.slane %v662_v37, 7  ;;  %v671_v40 = vrot.slane %v664_v38, 7  ;;  %v1157_v38 = vld [vmem:[%s1871_s4] ss:$0 sm:$0xff] }
 0x239   : > { %v659_v41 = vpop.permute.xlu1 %658  ;;  %v682_v42 = vsel %vm297_vm3, 0.0, %v671_v40  ;;  %v1748_v45 = vsel %vm297_vm3, 0.0, %v670_v39 }
 0x23a   : > { %v663_v43 = vsel %vm288_vm2, 0.0, %v659_v41  ;;  %v665_v44 = vsel %vm288_vm2, %v659_v41, 0.0  ;;  %1151 = vmatprep.mubr.msk.f32.mxu0 %vm367_vm4, %v682_v42  ;;  %v726_v52 = vrot.slane %v1748_v45, 1  ;;  %v729_v53 = vrot.slane %v682_v42, 1 }
 0x23b   : > { %v672_v46 = vrot.slane %v663_v43, 7  ;;  %v674_v47 = vrot.slane %v665_v44, 7  ;;  %1153 = vmatmul.mubr.msk.f32.vlgmr.msra.gmra.mxu0 %vm1629_vm5, %v670_v39  ;;  %v918_v3 = vrot.slane %v682_v42, 2  ;;  %v915_v24 = vrot.slane %v1748_v45, 2 }
 0x23d   : > { %v1753_v49 = vsel %vm297_vm3, %v674_v47, 0.0  ;;  %v1756_v50 = vsel %vm297_vm3, %v671_v40, %v674_v47  ;;  %v1759_v51 = vsel %vm297_vm3, %v670_v39, %v672_v46  ;;  %v1765_v54 = vsel %vm297_vm3, %v672_v46, 0.0 }
 0x23e   : > { %1154 = vmatprep.mubr.msk.f32.mxu0 %vm367_vm4, %v1756_v50  ;;  %v734_v48 = vrot.slane %v1753_v49, 1  ;;  %v730_v55 = vrot.slane %v1756_v50, 1  ;;  %v727_v56 = vrot.slane %v1759_v51, 1  ;;  %v732_v60 = vrot.slane %v1765_v54, 1 }
 0x23f   : > { %891 = vmatmul.mubr.f32.gmra.mxu0 %v1759_v51  ;;  %v919_v61 = vrot.slane %v1756_v50, 2  ;;  %v916_v21 = vrot.slane %v1759_v51, 2  ;;  %v923_v22 = vrot.slane %v1753_v49, 2  ;;  %v921_v25 = vrot.slane %v1765_v54, 2 }
 0x240   : > { %v731_v57 = vsel %vm354_vm6, %v729_v53, %v730_v55  ;;  %v728_v58 = vsel %vm354_vm6, %v726_v52, %v727_v56  ;;  %v735_v62 = vsel %vm354_vm6, %v730_v55, %v734_v48  ;;  %v733_v5 = vsel %vm354_vm6, %v727_v56, %v732_v60 }
 0x241   : > { %1149 = vmatprep.mubr.msk.f32.mxu1 %vm367_vm4, %v731_v57  ;;  %v920_v6 = vsel %vm545_vm7, %v918_v3, %v919_v61  ;;  %v917_v26 = vsel %vm545_vm7, %v915_v24, %v916_v21  ;;  %v924_v27 = vsel %vm545_vm7, %v919_v61, %v923_v22  ;;  %v922_v28 = vsel %vm545_vm7, %v916_v21, %v921_v25 }
 0x242   : > { %807 = vmatmul.mubr.f32.vlgmr.msra.gmra.mxu1 %v728_v58 }
 0x243   : > { %932 = vmatpush1.msra.mxu1 %v912_v59  ;;  %1150 = vmatprep.mubr.msk.f32.mxu1 %vm367_vm4, %v735_v62 }
 0x244   : > { %933 = vmatprep.subr.mxu1 %v1392_v0 }
 0x245   : > { %934 = vmatpush1.msra.mxu1 %v911_v63 }
 0x246   : > { %935 = vmatprep.subr.mxu1 %v1392_v0  ;;  %812 = vmatmul.mubr.f32.gmra.mxu1 %v733_v5 }
 0x247   : > { %936 = vmatpush1.msra.mxu1 %v910_v4  ;;  %1155 = vmatprep.mubr.msk.f32.mxu1 %vm367_vm4, %v920_v6 }
 0x248   : > { %937 = vmatprep.subr.mxu1 %v1392_v0 }
 0x249   : > { %938 = vmatpush1.msra.mxu1 %v909_v7 }
 0x24a   : > { %939 = vmatprep.subr.mxu1 %v1392_v0 }
 0x24b   : > { %940 = vmatpush1.msra.mxu1 %v908_v8 }
 0x24c   : > { %941 = vmatprep.subr.mxu1 %v1392_v0 }
 0x24d   : > { %942 = vmatpush1.msra.mxu1 %v907_v9 }
 0x24e   : > { %943 = vmatprep.subr.mxu1 %v1392_v0 }
 0x24f   : > { %944 = vmatpush1.msra.mxu1 %v906_v10 }
 0x250   : > { %945 = vmatprep.subr.mxu1 %v1392_v0 }
 0x251   : > { %946 = vmatpush1.msra.mxu1 %v905_v11 }
 0x252   : > { %947 = vmatprep.subr.mxu1 %v1392_v0 }
 0x253   : > { %948 = vmatpush1.msra.mxu1 %v904_v12 }
 0x254   : > { %949 = vmatprep.subr.mxu1 %v1392_v0 }
 0x255   : > { %950 = vmatpush1.msra.mxu1 %v903_v13 }
 0x256   : > { %951 = vmatprep.subr.mxu1 %v1392_v0 }
 0x257   : > { %952 = vmatpush1.msra.mxu1 %v902_v14 }
 0x258   : > { %953 = vmatprep.subr.mxu1 %v1392_v0 }
 0x259   : > { %954 = vmatpush1.msra.mxu1 %v901_v15 }
 0x25a   : > { %955 = vmatprep.subr.mxu1 %v1392_v0 }
 0x25b   : > { %956 = vmatpush1.msra.mxu1 %v900_v16 }
 0x25c   : > { %957 = vmatprep.subr.mxu1 %v1392_v0 }
 0x25d   : > { %958 = vmatpush1.msra.mxu1 %v899_v17 }
 0x25e   : > { %959 = vmatprep.subr.mxu1 %v1392_v0 }
 0x25f   : > { %960 = vmatpush1.msra.mxu1 %v898_v18 }
 0x260   : > { %961 = vmatprep.subr.mxu1 %v1392_v0 }
 0x261   : > { %962 = vmatpush1.msra.mxu1 %v897_v19 }
 0x262   : > { %991 = vmatprep.subr.mxu1 %v1392_v0 }
 0x263   : > { %992 = vmatpush2.msra.mxu1 %v914_v20 }
 0x264   : > { %993 = vmatprep.subr.mxu1 %v1392_v0 }
 0x265   : > { %994 = vmatpush2.msra.mxu1 %v913_v23 }
 0x266   : > { %996 = vmatmul.mubr.f32.vlgmr.msra.gmra.mxu1 %v917_v26 }
 0x267   : > { %1156 = vmatprep.mubr.msk.f32.mxu1 %vm367_vm4, %v924_v27 }
 0x26a   : > { %1001 = vmatmul.mubr.f32.gmra.mxu1 %v922_v28 }
 0x2fb   : > { %v887_v29 = vpop.f32.mrf.mxu0 }
 0x2fd   : > { %v889_v30 = vpop.f32.mrf.mxu0 }
 0x2ff   : > { %v892_v31 = vpop.f32.mrf.mxu0 }
 0x301   : > { %v894_v0 = vpop.f32.mrf.mxu0 }
 0x302   : > { %v808_v32 = vpop.f32.mrf.mxu1 }
 0x303   : > { %v888_v36 = vadd.f32 %v887_v29, %v808_v32 }
 0x304   : > { %v810_v33 = vpop.f32.mrf.mxu1 }
 0x306   : > { %v813_v34 = vpop.f32.mrf.mxu1 }
 0x307   : > { %v893_v41 = vadd.f32 %v892_v31, %v813_v34 }
 0x308   : > { %v815_v35 = vpop.f32.mrf.mxu1 }
 0x326   : > { %v997_v37 = vpop.f32.mrf.mxu1 }
 0x327   : > { %v1006_v39 = vadd.f32 %v997_v37, %v888_v36 }
 0x328   : > { %v999_v40 = vpop.f32.mrf.mxu1 }
 0x329   : > { %v1015_v42 = vadd.f32 %v1157_v38, %v1006_v39 }
 0x32a   : > { %v1002_v43 = vpop.f32.mrf.mxu1 }
 0x32b   : > { %v1017_v44 = vadd.f32 %v1015_v42, %v1578_v1  ;;  %v1007_v45 = vadd.f32 %v1002_v43, %v893_v41 }
 0x32c   : > { %v1004_v46 = vpop.f32.mrf.mxu1 }
 0x32d   : > { %1019 = vst [vmem:[%s271_s14] sm:$0xff] %v1017_v44  ;;  %v1016_v47 = vadd.f32 %v1157_v38, %v1007_v45 }
 0x32f   : > { %v1018_v49 = vadd.f32 %v1016_v47, %v1580_v2 }
 0x331   : > { %1020 = vst [vmem:[%s271_s14 + $0x8] sm:$0xff] %v1018_v49 }
 0x332   : > { %1330 = shalt.err (!%p1327_p3)
}
 0x333   : > { %s1331_s26 = scalar_lea.hbm %s1823_s17, 256  ;;  %s1335_s12 = scalar_lea.hbm %s1872_s5, 512 }
 0x334   : > { %p1332_p11 = scmp.ne.s32.totalorder %s1823_s17, %s1331_s26  ;;  %p1336_p4 = scmp.lt.s32.totalorder %s1823_s17, %s1872_s5 }
 0x335   : > { %p1337_p6 = scmp.lt.s32.totalorder %s1335_s12, %s1331_s26 }
 0x336   : > { %p1333_p9 = pnand %p1332_p11, %p1891_p2 }
 0x337   : > { %p1338_p8 = por %p1337_p6, %p1336_p4 }
 0x338   : > { %p1334_p1 = pneg %p1333_p9 }
 0x33a   : > { %p1339_p5 = pnand %p1338_p8, %p1334_p1 }
 0x33c   : > { %1342 = shalt.err (!%p1339_p5)
}
 0x33d   : > { %s1395_s28 = smov 128  }
 0x33e   : > { %1175 = dma.vmem_to_hbm [thread:$0]  (%p1891_p2), %s1817_s6, 256, %s1823_s17, %s1022_s16, %s1395_s28, %s1395_s28, %s1393_s24  }
 0x33f PF: > { %s1050_s11 = sand.u32 1, %s1373_s18   ;;  %p1892_p7 = scmp.ne.s32.totalorder %s1879_s25, 0 }
 0x340   : > { %p1893_p12 = scmp.ge.s32.totalorder %s1385_s21, 2  ;;  %s1051_s8 = scalar_lea.sflag [#allocation4], %s1050_s11 }
 0x342   : > { %p1189_p13 = pnand %p1893_p12, %p1892_p7 }
 0x344   : > { %p1190_p0 = pneg %p1189_p13 }
 0x346   : > { %1368 = dma.done.wait (%p1190_p0), %s1051_s8, 256  }
 0x347   : > { %1370 = vsyncadd (%p1190_p0), %s1051_s8, 4294967040  ;;  %p19_p10 = scmp.ge.s32.totalorder %s1504_s15, 4   ;;  %s1894_s18 = smov %s1377_s19 }
 0x348   : > { %s1895_s19 = smov %s1381_s20  ;;  %s1896_s20 = smov %s1520_s27 }
 0x349   : > { %s1897_s21 = smov %s1504_s15  ;;  %21 = sbr.rel (!%p19_p10) target bundleno = 6 (0x6), region = 97 }
 0x34e   :  { %1056 = vsyncpa [#allocation3], 1 }
 0x34f   :  { %1058 = vsyncpa [#allocation3 + $0x1], 1 }
 0x350   :  { %1059 = vsyncpa [#allocation6], 1 }
 0x351   :  { %1060 = vsyncpa [#allocation4], 1 }
 0x352   :  { %1062 = vsyncpa [#allocation4 + $0x1], 1 }

</bundles_post_ra>
